<compile_context>
chip_gen: v7x
topology: tpu7x:2x2x1
jax: 0.10.0
libtpu: 0.0.40
codegen_flags: <defaults>
</compile_context>

<pallas_src>
import jax
import jax.numpy as jnp
from jax.experimental import pallas as pl
from jax.experimental.pallas import tpu as pltpu

_LANE = 128
_MIB = 1024 * 1024
_MIN_SPLIT_BYTES = 2 * _MIB  # below this, a forced multi-core split is pure overhead


def _hsigmoid_kernel(x_ref, o_ref):
    x = x_ref[...]
    # relu6(x + 3) / 6  ==  clip(x + 3, 0, 6) * (1/6)
    o_ref[...] = (jnp.clip(x + 3.0, 0.0, 6.0) * (1.0 / 6.0)).astype(o_ref.dtype)


def _tpu_config():
    """Per-generation (block_bytes, vmem_limit_bytes, num_tensorcores).

    v5e/v6e: 128 MiB physical VMEM, 1 TC/chip.  Default scoped limit is only
    16/32 MiB, so we raise it explicitly and use 8 MiB blocks
    (4 pipeline buffers -> 32 MiB, far under physical).
    v7x: 64 MiB physical VMEM per TC, 2 TCs/chip.  10 MiB blocks -> 40 MiB of
    pipeline buffers, leaving headroom under the 48 MiB limit and under
    physical VMEM for internal scratch.
    """
    block_bytes, vmem_limit, num_cores = 8 * _MIB, 48 * _MIB, 1
    try:
        info = pltpu.get_tpu_info()
        vmem = getattr(info, "vmem_capacity_bytes", None)
        if vmem is not None and vmem <= 96 * _MIB:
            # 64 MiB-per-core class chip (v7x): 2 TensorCores, faster HBM.
            block_bytes, vmem_limit, num_cores = 10 * _MIB, 48 * _MIB, 2
    except Exception:
        pass  # fall back to conservative single-core defaults
    return block_bytes, vmem_limit, num_cores


def _run_slab(slab, block_bytes, vmem_limit, num_cores, donate_input):
    """Run the elementwise kernel over a lane-aligned 2D slab (rows, width)."""
    rows, width = slab.shape
    dtype = slab.dtype
    itemsize = jnp.dtype(dtype).itemsize
    # Sublane multiple: 8 for 32-bit, 16 for 16-bit, 32 for 8-bit dtypes.
    sub = max(8, 32 // itemsize)

    total_bytes = rows * width * itemsize
    steps = pl.cdiv(total_bytes, block_bytes)
    if num_cores > 1 and rows > sub and total_bytes >= _MIN_SPLIT_BYTES:
        # Balance across TensorCores: grid length is a multiple of the core
        # count with near-equal blocks (avoids a ragged last block leaving one
        # v7x core idle).  Never forced on single-TC chips.
        steps = pl.cdiv(max(steps, num_cores), num_cores) * num_cores

    if steps <= 1 or rows <= sub:
        # One full-extent block (block dim == array dim is always legal).
        tile_rows = rows
    else:
        tile_rows = pl.cdiv(pl.cdiv(rows, steps), sub) * sub
        tile_rows = min(max(tile_rows, sub), rows)

    grid = (pl.cdiv(rows, tile_rows),)
    n_elem = rows * width

    return pl.pallas_call(
        _hsigmoid_kernel,
        out_shape=jax.ShapeDtypeStruct((rows, width), dtype),
        grid=grid,
        in_specs=[pl.BlockSpec((tile_rows, width), lambda i: (i, 0))],
        out_specs=pl.BlockSpec((tile_rows, width), lambda i: (i, 0)),
        compiler_params=pltpu.CompilerParams(
            dimension_semantics=("parallel",),
            vmem_limit_bytes=vmem_limit,
        ),
        cost_estimate=pl.CostEstimate(
            flops=4 * n_elem,
            transcendentals=0,
            bytes_accessed=2 * n_elem * itemsize,
        ),
        input_output_aliases={0: 0} if donate_input else {},
    )(slab)


def hsigmoid(x: jax.Array, *, donate_input: bool = False) -> jax.Array:
    """Elementwise hard-sigmoid, matching F.relu6(x + 3) / 6 semantics.

    Set donate_input=True only when the input activation is dead after this
    op (lets XLA reuse the input HBM buffer for the output).
    """
    orig_shape = x.shape
    dtype = x.dtype
    n = x.size
    if n == 0:
        return x

    if n < _LANE:
        # Less than one vreg row of data: the pallas_call overhead dominates.
        return (jnp.clip(x + 3.0, 0.0, 6.0) * (1.0 / 6.0)).astype(dtype)

    block_bytes, vmem_limit, num_cores = _tpu_config()

    flat = x.reshape(-1)  # free (bitcast) for contiguous inputs
    n_main = (n // _LANE) * _LANE  # 128-aligned prefix

    # Widen lanes when divisible -> fewer, lane-denser rows (no data copy).
    width = next(w for w in (1024, 512, 256, 128) if n_main % w == 0)
    rows = n_main // width

    main = flat if n_main == n else flat[:n_main]
    out_main = _run_slab(
        main.reshape(rows, width), block_bytes, vmem_limit, num_cores, donate_input
    )
    out_flat = out_main.reshape(-1)

    if n_main != n:
        # <=127-element ragged tail: tiny jnp epilogue instead of padding the
        # whole array and re-slicing the output (saves full-array HBM passes).
        tail = flat[n_main:]
        tail_out = (jnp.clip(tail + 3.0, 0.0, 6.0) * (1.0 / 6.0)).astype(dtype)
        out_flat = jnp.concatenate([out_flat, tail_out])

    return out_flat.reshape(orig_shape)


if __name__ == "__main__":
    key = jax.random.PRNGKey(0)

    # NCHW input: batch=2, channels=4, spatial=16x16 (size divisible by 128 ->
    # zero-copy aligned fast path).
    x = jax.random.normal(key, (2, 4, 16, 16), dtype=jnp.float32) * 4.0
    y = jax.block_until_ready(hsigmoid(x))
    y_ref = jnp.clip(x + 3.0, 0.0, 6.0) / 6.0
    assert y.shape == x.shape and y.dtype == x.dtype
    assert jnp.allclose(y, y_ref, atol=1e-6), "mismatch vs reference (aligned path)"

    # Ragged path (size % 128 != 0): aligned prefix through the kernel plus
    # a tiny jnp tail epilogue.
    x2 = jax.random.normal(jax.random.PRNGKey(1), (3, 5, 7, 11), dtype=jnp.float32) * 4.0
    y2 = jax.block_until_ready(hsigmoid(x2))
    y2_ref = jnp.clip(x2 + 3.0, 0.0, 6.0) / 6.0
    assert y2.shape == x2.shape and y2.dtype == x2.dtype
    assert jnp.allclose(y2, y2_ref, atol=1e-6), "mismatch vs reference (ragged path)"

    # Typical MobileNetV3 feature-map shape: exercises a full-extent block with
    # rows not a multiple of the sublane count (legal: block dim == array dim).
    x3 = jax.random.normal(jax.random.PRNGKey(2), (2, 16, 56, 56), dtype=jnp.float32) * 4.0
    y3 = jax.block_until_ready(hsigmoid(x3))
    y3_ref = jnp.clip(x3 + 3.0, 0.0, 6.0) / 6.0
    assert y3.shape == x3.shape and y3.dtype == x3.dtype
    assert jnp.allclose(y3, y3_ref, atol=1e-6), "mismatch vs reference (feature-map path)"

    print("KERNEL_OK")
</pallas_src>

<mosaic_0001>
module attributes {stable_mosaic.version = 11 : i64} {
  func.func @_hsigmoid_kernel(%arg0: i32, %arg1: memref<2x1024xf32, #tpu.memory_space<vmem>>, %arg2: memref<2x1024xf32, #tpu.memory_space<vmem>>) attributes {dimension_semantics = [#tpu.dimension_semantics<parallel>], iteration_bounds = array<i64: 1>, scalar_prefetch = 0 : i64, scratch_operands = 0 : i64, tpu.core_type = #tpu.core_type<tc>, window_params = [{transform_indices = @transform_0, window_bounds = array<i64: 2, 1024>}, {transform_indices = @transform_1, window_bounds = array<i64: 2, 1024>}]} {
    %c0 = arith.constant 0 : index
    %c0_0 = arith.constant 0 : index
    %0 = vector.load %arg1[%c0, %c0_0] : memref<2x1024xf32, #tpu.memory_space<vmem>>, vector<2x1024xf32>
    %cst = arith.constant 3.000000e+00 : f32
    %1 = vector.broadcast %cst : f32 to vector<2x1024xf32>
    %2 = arith.addf %0, %1 : vector<2x1024xf32>
    %cst_1 = arith.constant 0.000000e+00 : f32
    %cst_2 = arith.constant 6.000000e+00 : f32
    %3 = vector.broadcast %cst_1 : f32 to vector<2x1024xf32>
    %4 = arith.maximumf %3, %2 : vector<2x1024xf32>
    %5 = vector.broadcast %cst_2 : f32 to vector<2x1024xf32>
    %6 = arith.minimumf %5, %4 : vector<2x1024xf32>
    %cst_3 = arith.constant 0.166666672 : f32
    %7 = vector.broadcast %cst_3 : f32 to vector<2x1024xf32>
    %8 = arith.mulf %6, %7 : vector<2x1024xf32>
    %c0_4 = arith.constant 0 : index
    %c0_5 = arith.constant 0 : index
    %9 = vector.load %arg2[%c0_4, %c0_5] : memref<2x1024xf32, #tpu.memory_space<vmem>>, vector<2x1024xf32>
    tpu.vector_store %arg2[%c0_4, %c0_5], %8 {strides = array<i32>} : memref<2x1024xf32, #tpu.memory_space<vmem>>, vector<2x1024xf32>,
    return
  }
  func.func @transform_0(%arg0: i32) -> (i32, i32) {
    %c0_i32 = arith.constant 0 : i32
    %c0_i32_0 = arith.constant 0 : i32
    return %arg0, %c0_i32 : i32, i32
  }
  func.func @transform_1(%arg0: i32) -> (i32, i32) {
    %c0_i32 = arith.constant 0 : i32
    %c0_i32_0 = arith.constant 0 : i32
    return %arg0, %c0_i32 : i32, i32
  }
}

</mosaic_0001>

<bundles_post_ra>
// kernel: tpu_custom_call.1
= control target key start
LH: loop header
LB: loop body
LE: loop exit
PB: predicated region body
PF: predicated region fallthrough
CT: control target
= control target key end

     0   :  { %6 = vsyncpa [#allocation3], 0  ;;  %s134_s0 = inlined_call_operand.hbm [shape: f32[2,1024], index: 0, kind: input, shape index: {}]   ;;  %s135_s1 = inlined_call_operand.hbm [shape: f32[2,1024], index: 1, kind: output, shape index: {}]  }
   0x1   :  { %7 = vsyncpa [#allocation4], 0  ;;  %s98_s6 = smov [#allocation2]   ;;  %s50_s10 = scalar_lea.hbm %s134_s0, 256 }
   0x2   :  { %s14_s7 = sshll.u32 %s98_s6, 4  ;;  %p51_p0 = scmp.ne.s32.totalorder %s134_s0, %s50_s10  ;;  %s15_s7 = int_to_ptr.vmem [resolvable:$true] %s14_s7 }
   0x3   :  { %p54_p1 = scmp.lt.u32.totalorder %s50_s10, %s134_s0 }
   0x5   :  { %p56_p2 = pnand %p54_p1, %p51_p0 }
   0x7   :  { %59 = shalt.err (!%p56_p2)
}
   0x8   :  { %s60_s15 = scalar_lea.vmem %s15_s7, 256  ;;  %p65_p4 = scmp.lt.s32.totalorder %s15_s7, %s15_s7 }
   0x9   :  { %p61_p3 = scmp.ne.s32.totalorder %s15_s7, %s60_s15  ;;  %p66_p5 = scmp.lt.s32.totalorder %s60_s15, %s60_s15 }
   0xb   :  { %p67_p6 = por %p66_p5, %p65_p4 }
   0xd   :  { %p68_p7 = pnand %p67_p6, %p61_p3 }
   0xf   :  { %71 = shalt.err (!%p68_p7)
}
  0x10   :  { %17 = dma.hbm_to_vmem [thread:$0]  %s134_s0, 256, %s15_s7, [#allocation3]  }
  0x11   :  { %94 = dma.done.wait [#allocation3], 256  }
  0x12   :  { %95 = vsyncadd [#allocation3], 4294967040  ;;  %v21_v0 = vld [vmem:[#allocation2] sm:$0xff]  ;;  %v22_v1 = vld [vmem:[#allocation2 + $0x8] sm:$0xff]  ;;  %s99_s18 = smov [#allocation5]  }
  0x13   :  { %v23_v2 = vadd.f32 3.0, %v21_v0  ;;  %v24_v3 = vadd.f32 3.0, %v22_v1  ;;  %s39_s19 = sshll.u32 %s99_s18, 4  ;;  %s40_s19 = int_to_ptr.vmem [resolvable:$true] %s39_s19 }
  0x14   :  { %s72_s20 = scalar_lea.vmem %s40_s19, 256  ;;  %p77_p9 = scmp.lt.s32.totalorder %s40_s19, %s40_s19 }
  0x15   :  { %v25_v4 = vmax.f32 %v23_v2, 0.0  ;;  %v26_v5 = vmax.f32 %v24_v3, 0.0  ;;  %p73_p8 = scmp.ne.s32.totalorder %s40_s19, %s72_s20  ;;  %p78_p10 = scmp.lt.s32.totalorder %s72_s20, %s72_s20 }
  0x17   :  { %v27_v6 = vmin.f32 %v25_v4, 6.0  ;;  %v28_v7 = vmin.f32 %v26_v5, 6.0  ;;  %p79_p11 = por %p78_p10, %p77_p9 }
  0x19   :  { %v29_v8 = vmul.f32 0.16666667, %v27_v6  ;;  %v30_v9 = vmul.f32 0.16666667, %v28_v7  ;;  %p80_p12 = pnand %p79_p11, %p73_p8 }
  0x1b   :  { %31 = vst [vmem:[#allocation5] sm:$0xff] %v29_v8  ;;  %32 = vst [vmem:[#allocation5 + $0x8] sm:$0xff] %v30_v9 }
  0x1c   :  { %83 = shalt.err (!%p80_p12)
}
  0x1d   :  { %s84_s22 = scalar_lea.hbm %s135_s1, 256 }
  0x1e   :  { %p85_p13 = scmp.ne.s32.totalorder %s135_s1, %s84_s22  ;;  %p88_p0 = scmp.lt.u32.totalorder %s84_s22, %s135_s1 }
  0x20   :  { %p90_p1 = pnand %p88_p0, %p85_p13 }
  0x22   :  { %93 = shalt.err (!%p90_p1)
}
  0x23   :  { %42 = dma.vmem_to_hbm [thread:$0]  %s40_s19, 256, %s135_s1, [#allocation4]  }
  0x24   :  { %96 = dma.done.wait [#allocation4], 256  }
  0x25   :  { %97 = vsyncadd [#allocation4], 4294967040 }
  0x26   :  { %46 = vsyncpa [#allocation3], 1 }
  0x27   :  { %47 = vsyncpa [#allocation4], 1 }

</bundles_post_ra>
